<compile_context>
chip_gen: v7x
topology: tpu7x:2x2x1
jax: 0.10.0
libtpu: 0.0.40
codegen_flags: <defaults>
</compile_context>

<pallas_src>
import jax
import jax.numpy as jnp
from jax.experimental import pallas as pl
from jax.experimental.pallas import tpu as pltpu

LANE = 128
# Double-buffered x + w tile budget per reduction step; conservative for every generation
# (v5e 16 MiB scoped default, v6e 32 MiB, v7x 32 MiB scoped / 64 MiB physical).
_TILE_BUDGET_BYTES = 12 * 1024 * 1024
_VMEM_LIMIT_BYTES = 32 * 1024 * 1024


def _choose_batch_tile(n):
    """Largest divisor of n that is <= 8 and leaves >= 2 'parallel' grid rows when n >= 2
    (v7x has two TensorCores; v5e/v6e are indifferent)."""
    cap = min(8, n)
    if n >= 2:
        cap = min(cap, max(1, n // 2))
    for t in range(cap, 0, -1):
        if n % t == 0:
            return t
    return 1


def _choose_reduction_tile(kb, tn, x_itemsize, budget_bytes):
    """Pick (tkb, kb_padded): number of 128-lane blocks handled per reduction step.

    Keeps 2*(tn*tkb*128*itemsize) [x, double-buffered] + 2*(tkb*128*4) [w] under budget.
    Prefers tkb == kb (single reduction step) or an 8-aligned exact divisor of kb; only
    zero-pads the reduction axis when kb has no usable divisor (padding adds zero terms).
    """
    denom = LANE * (2 * tn * x_itemsize + 2 * 4)
    cap = max(8, budget_bytes // denom)
    if kb <= cap:
        return kb, kb  # whole reduction in one grid step
    cap8 = max(8, (cap // 8) * 8)
    d = cap8
    while d >= max(8, cap8 // 8):
        if kb % d == 0:
            return d, kb
        d -= 8
    tkb = cap8
    return tkb, pl.cdiv(kb, tkb) * tkb


def _effnet_head_kernel(x_ref, w_ref, b_ref, o_ref, acc_ref):
    """Fused global-avg-pool + linear head as a lane-blocked weighted sum.

    x_ref:   (tn, tkb, 128) feature tile (flattened NCHW, lane-folded)
    w_ref:   (1, tkb, 128)  matching slice of the pre-scaled fc weight (w[c]/HW per slot)
    b_ref:   (1,)           fc bias in SMEM
    o_ref:   (tn, 1, 1)     logits tile
    acc_ref: (tn, 128)      f32 lane-blocked accumulator (persists across the k axis)
    """
    k = pl.program_id(1)

    @pl.when(k == 0)
    def _():
        acc_ref[...] = jnp.zeros_like(acc_ref)

    # Hot path: VPU broadcast-multiply + sublane-block fold into lane-wide partial sums.
    # Accumulation is always f32 (v5e has no bf16 VALU; cast is a no-op for f32 inputs).
    x = x_ref[...].astype(jnp.float32)          # (tn, tkb, 128)
    w = w_ref[...].astype(jnp.float32)          # (1,  tkb, 128)
    acc_ref[...] += jnp.sum(x * w, axis=1)      # (tn, 128)

    @pl.when(k == pl.num_programs(1) - 1)
    def _():
        # Single cross-lane reduce + bias, once per output tile.
        # Dropout(0.2) is identity in eval mode.
        tot = jnp.sum(acc_ref[...], axis=-1, keepdims=True)        # (tn, 1)
        o_ref[...] = (tot + b_ref[0]).reshape(o_ref.shape).astype(o_ref.dtype)


def prepare_head_params(fc_weight, fc_bias, H, W):
    """Fold the avg-pool's 1/(H*W) into the fc weight and lay it out as lane blocks
    (1, ceil(C*H*W/128), 128). Call ONCE per model, not per forward call."""
    C = fc_weight.shape[-1]
    HW = H * W
    K = C * HW
    kb = pl.cdiv(K, LANE)
    w = jnp.broadcast_to((fc_weight.reshape(C, 1) / HW).astype(jnp.float32), (C, HW))
    w = w.reshape(1, K)
    if kb * LANE != K:
        w = jnp.pad(w, ((0, 0), (0, kb * LANE - K)))
    return w.reshape(1, kb, LANE), fc_bias.reshape(1).astype(jnp.float32)


def effnet_head_apply(feats_nchw, w_blocks, bias):
    """feats_nchw: (N, C, H, W) f32/bf16; w_blocks/bias from prepare_head_params -> (N, 1) f32."""
    N, C, H, W = feats_nchw.shape
    K = C * H * W
    kb = w_blocks.shape[1]

    x = feats_nchw.reshape(N, K)                      # free, contiguous (no HBM transpose)
    if kb * LANE != K:                                # K not a multiple of 128 (rare): zero-pad
        x = jnp.pad(x, ((0, 0), (0, kb * LANE - K)))
    x = x.reshape(N, kb, LANE)                        # free: fold K into the sublane/lane axes

    tn = _choose_batch_tile(N)
    tkb, kb_pad = _choose_reduction_tile(kb, tn, x.dtype.itemsize, _TILE_BUDGET_BYTES)
    if kb_pad != kb:                                  # poor factorization (rare): zero-pad tail
        x = jnp.pad(x, ((0, 0), (0, kb_pad - kb), (0, 0)))
        w_blocks = jnp.pad(w_blocks, ((0, 0), (0, kb_pad - kb), (0, 0)))

    k_steps = kb_pad // tkb
    grid = (N // tn, k_steps)

    # When k_steps == 1 the weight block index is constant -> fetched exactly once (resident).
    w_fetches = 1 if k_steps == 1 else (N // tn)
    cost = pl.CostEstimate(
        flops=2 * N * K,
        transcendentals=0,
        bytes_accessed=(N * kb_pad * LANE * x.dtype.itemsize
                        + w_fetches * kb_pad * LANE * 4 + N * 4 + 4),
    )

    out = pl.pallas_call(
        _effnet_head_kernel,
        out_shape=jax.ShapeDtypeStruct((N, 1, 1), jnp.float32),
        grid=grid,
        in_specs=[
            pl.BlockSpec((tn, tkb, LANE), lambda i, k: (i, k, 0)),
            pl.BlockSpec((1, tkb, LANE), lambda i, k: (0, k, 0)),
            pl.BlockSpec(memory_space=pltpu.MemorySpace.SMEM),
        ],
        out_specs=pl.BlockSpec((tn, 1, 1), lambda i, k: (i, 0, 0)),
        scratch_shapes=[pltpu.VMEM((tn, LANE), jnp.float32)],
        compiler_params=pltpu.CompilerParams(
            dimension_semantics=("parallel", "arbitrary"),
            vmem_limit_bytes=_VMEM_LIMIT_BYTES,
        ),
        cost_estimate=cost,
    )(x, w_blocks, bias)
    return out.reshape(N, 1)


def effnet_head(feats_nchw, fc_weight, fc_bias):
    """Convenience one-shot wrapper. For repeated inference, call prepare_head_params once
    and reuse effnet_head_apply."""
    _, _, H, W = feats_nchw.shape
    w_blocks, bias = prepare_head_params(fc_weight, fc_bias, H, W)
    return effnet_head_apply(feats_nchw, w_blocks, bias)


def effnet_head_reference(feats_nchw, fc_weight, fc_bias):
    pooled = jnp.mean(feats_nchw.astype(jnp.float32), axis=(2, 3))   # (N, C)
    return pooled @ fc_weight.T.astype(jnp.float32) + fc_bias[None, :].astype(jnp.float32)


if __name__ == "__main__":
    # arch='b3' => 1536 feature channels from the backbone; small spatial map for the demo.
    N, C, H, W = 2, 1536, 4, 4

    key = jax.random.PRNGKey(0)
    k_feat, k_w, k_b = jax.random.split(key, 3)

    # Synthetic backbone output (what encoder.forward_features would emit).
    feats = jax.random.normal(k_feat, (N, C, H, W), dtype=jnp.float32)

    # Linear(1536, 1): weight (1, 1536), bias (1,).
    bound = 1.0 / (C ** 0.5)
    fc_weight = jax.random.uniform(k_w, (1, C), minval=-bound, maxval=bound,
                                   dtype=jnp.float32)
    fc_bias = jax.random.uniform(k_b, (1,), minval=-bound, maxval=bound,
                                 dtype=jnp.float32)

    # Prepare the pooled fc weight once (hoisted out of the per-call path), then run.
    w_blocks, bias = prepare_head_params(fc_weight, fc_bias, H, W)
    out = jax.block_until_ready(effnet_head_apply(feats, w_blocks, bias))

    ref = effnet_head_reference(feats, fc_weight, fc_bias)
    assert out.shape == (N, 1), out.shape
    assert jnp.allclose(out, ref, atol=1e-4, rtol=1e-4), (out, ref)

    print("KERNEL_OK")
</pallas_src>

<mosaic_0001>
module attributes {stable_mosaic.version = 11 : i64} {
  func.func @_effnet_head_kernel(%arg0: i32, %arg1: i32, %arg2: memref<1x192x128xf32, #tpu.memory_space<vmem>>, %arg3: memref<1x192x128xf32, #tpu.memory_space<vmem>>, %arg4: memref<1xf32, #tpu.memory_space<smem>>, %arg5: memref<1x1x1xf32, #tpu.memory_space<vmem>>, %arg6: memref<1x128xf32, #tpu.memory_space<vmem>>) attributes {dimension_semantics = [#tpu.dimension_semantics<parallel>, #tpu.dimension_semantics<arbitrary>], iteration_bounds = array<i64: 2, 1>, scalar_prefetch = 0 : i64, scratch_operands = 1 : i64, tpu.core_type = #tpu.core_type<tc>, window_params = [{transform_indices = @transform_0, window_bounds = array<i64: 1, 192, 128>}, {transform_indices = @transform_1, window_bounds = array<i64: 1, 192, 128>}, {transform_indices = @transform_2, window_bounds = array<i64: 1>}, {transform_indices = @transform_3, window_bounds = array<i64: 1, 1, 1>}]} {
    %c0_i32 = arith.constant 0 : i32
    %0 = arith.cmpi eq, %arg1, %c0_i32 : i32
    %1 = arith.extui %0 : i1 to i32
    %c0_i32_0 = arith.constant 0 : i32
    %2 = arith.cmpi ne, %1, %c0_i32_0 : i32
    scf.if %2 {
      %cst_12 = arith.constant 0.000000e+00 : f32
      %13 = vector.broadcast %cst_12 : f32 to vector<1x128xf32>
      %c0_13 = arith.constant 0 : index
      %c0_14 = arith.constant 0 : index
      %14 = vector.load %arg6[%c0_13, %c0_14] : memref<1x128xf32, #tpu.memory_space<vmem>>, vector<1x128xf32>
      tpu.vector_store %arg6[%c0_13, %c0_14], %13 {strides = array<i32>} : memref<1x128xf32, #tpu.memory_space<vmem>>, vector<1x128xf32>,
    } else {
    }
    %c0 = arith.constant 0 : index
    %c0_1 = arith.constant 0 : index
    %c0_2 = arith.constant 0 : index
    %3 = vector.load %arg2[%c0, %c0_1, %c0_2] : memref<1x192x128xf32, #tpu.memory_space<vmem>>, vector<1x192x128xf32>
    %c0_3 = arith.constant 0 : index
    %c0_4 = arith.constant 0 : index
    %c0_5 = arith.constant 0 : index
    %4 = vector.load %arg3[%c0_3, %c0_4, %c0_5] : memref<1x192x128xf32, #tpu.memory_space<vmem>>, vector<1x192x128xf32>
    %c0_6 = arith.constant 0 : index
    %c0_7 = arith.constant 0 : index
    %5 = vector.load %arg6[%c0_6, %c0_7] : memref<1x128xf32, #tpu.memory_space<vmem>>, vector<1x128xf32>
    %6 = arith.mulf %3, %4 : vector<1x192x128xf32>
    %cst = arith.constant dense<0.000000e+00> : vector<1x128xf32>
    %7 = vector.multi_reduction <add>, %6, %cst [1] : vector<1x192x128xf32> to vector<1x128xf32>
    %8 = arith.addf %5, %7 : vector<1x128xf32>
    %c0_8 = arith.constant 0 : index
    %c0_9 = arith.constant 0 : index
    %9 = vector.load %arg6[%c0_8, %c0_9] : memref<1x128xf32, #tpu.memory_space<vmem>>, vector<1x128xf32>
    tpu.vector_store %arg6[%c0_8, %c0_9], %8 {strides = array<i32>} : memref<1x128xf32, #tpu.memory_space<vmem>>, vector<1x128xf32>,
    %c0_i32_10 = arith.constant 0 : i32
    %10 = arith.cmpi eq, %arg1, %c0_i32_10 : i32
    %11 = arith.extui %10 : i1 to i32
    %c0_i32_11 = arith.constant 0 : i32
    %12 = arith.cmpi ne, %11, %c0_i32_11 : i32
    scf.if %12 {
      %c0_12 = arith.constant 0 : index
      %c0_13 = arith.constant 0 : index
      %13 = vector.load %arg6[%c0_12, %c0_13] : memref<1x128xf32, #tpu.memory_space<vmem>>, vector<1x128xf32>
      %cst_14 = arith.constant dense<0.000000e+00> : vector<1xf32>
      %14 = vector.multi_reduction <add>, %13, %cst_14 [1] : vector<1x128xf32> to vector<1xf32>
      %15 = vector.shape_cast %14 : vector<1xf32> to vector<1x1xf32>
      %c0_15 = arith.constant 0 : index
      %16 = memref.load %arg4[%c0_15] : memref<1xf32, #tpu.memory_space<smem>>
      %17 = vector.broadcast %16 : f32 to vector<1x1xf32>
      %18 = arith.addf %15, %17 : vector<1x1xf32>
      %19 = vector.shape_cast %18 : vector<1x1xf32> to vector<1x1x1xf32>
      %c0_16 = arith.constant 0 : index
      %c0_17 = arith.constant 0 : index
      %c0_18 = arith.constant 0 : index
      %20 = vector.load %arg5[%c0_16, %c0_17, %c0_18] : memref<1x1x1xf32, #tpu.memory_space<vmem>>, vector<1x1x1xf32>
      tpu.vector_store %arg5[%c0_16, %c0_17, %c0_18], %19 {strides = array<i32>} : memref<1x1x1xf32, #tpu.memory_space<vmem>>, vector<1x1x1xf32>,
    } else {
    }
    return
  }
  func.func @transform_0(%arg0: i32, %arg1: i32) -> (i32, i32, i32) {
    %c0_i32 = arith.constant 0 : i32
    %c0_i32_0 = arith.constant 0 : i32
    return %arg0, %arg1, %c0_i32 : i32, i32, i32
  }
  func.func @transform_1(%arg0: i32, %arg1: i32) -> (i32, i32, i32) {
    %c0_i32 = arith.constant 0 : i32
    %c0_i32_0 = arith.constant 0 : i32
    %c0_i32_1 = arith.constant 0 : i32
    return %c0_i32, %arg1, %c0_i32_0 : i32, i32, i32
  }
  func.func @transform_2(%arg0: i32, %arg1: i32) -> i32 {
    %c0_i32 = arith.constant 0 : i32
    %c0_i32_0 = arith.constant 0 : i32
    return %c0_i32 : i32
  }
  func.func @transform_3(%arg0: i32, %arg1: i32) -> (i32, i32, i32) {
    %c0_i32 = arith.constant 0 : i32
    %c0_i32_0 = arith.constant 0 : i32
    %c0_i32_1 = arith.constant 0 : i32
    return %arg0, %c0_i32, %c0_i32_0 : i32, i32, i32
  }
}

</mosaic_0001>

<bundles_post_ra>
// kernel: tpu_custom_call.1
= control target key start
LH: loop header
LB: loop body
LE: loop exit
PB: predicated region body
PF: predicated region fallthrough
CT: control target
= control target key end

     0   :  { %s847_s0 = inlined_call_operand.hbm [shape: f32[2,192,128], index: 0, kind: input, shape index: {}]   ;;  %s848_s1 = inlined_call_operand.hbm [shape: f32[1,192,128], index: 1, kind: input, shape index: {}]   ;;  %s849_s2 = inlined_call_operand.<no memory space> [shape: f32[1], index: 2, kind: input, shape index: {}]   ;;  %s850_s3 = inlined_call_operand.vmem [shape: f32[2,1,1], index: 3, kind: output, shape index: {}]  }
   0x1   :  { %8 = sst [smem:[#allocation3]] %s849_s2 }
   0x2   :  { %9 = vsyncpa [#allocation5], 0 }
   0x3   :  { %11 = vsyncpa [#allocation5 + $0x1], 0 }
   0x4   :  { %12 = vsyncpa [#allocation7], 0  ;;  %s657_s14 = smov 0   ;;  %s659_s15 = smov 0  }
   0x5   :  { %s661_s16 = smov 0   ;;  %s663_s17 = smov 0  }
   0x6   :  { %s665_s18 = smov 0   ;;  %s667_s19 = smov 0  }
   0x7 LB: > { %s433_s2 = sadd.s32 4294967295, %s627_s19   ;;  %p52_p0 = scmp.ne.s32.totalorder %s611_s15, %s607_s14  ;;  %s627_s19 = sphi %s667_s19, %s18_s19   ;;  %s623_s18 = sphi %s665_s18, %s867_s18   ;;  %s619_s17 = sphi %s663_s17, %s866_s17   ;;  %s615_s16 = sphi %s661_s16, %s865_s16   ;;  %s611_s15 = sphi %s659_s15, %s864_s15   ;;  %s607_s14 = sphi %s657_s14, %s863_s14  }
   0x8   : > { %p687_p1 = scmp.eq.s32.totalorder %s433_s2, 0  ;;  %p435_p2 = scmp.ge.s32.totalorder %s627_s19, 1 }
   0x9   : > { %p136_p3 = scmp.lt.s32.totalorder %s627_s19, 3  ;;  %s629_s23 = smov [#allocation6]  }
   0xa   : > { %s855_s20 = scalar_select %p687_p1, 1, 0 }
   0xb   : > { %p695_p4 = por %p687_p1, %p52_p0  ;;  %p699_p5 = pnand %p435_p2, %p136_p3 }
   0xc   : > { %s151_s24 = sshll.u32 %s629_s23, 4  ;;  %s30_s26 = sadd.s32 1, %s623_s18  ;;  %s152_s24 = int_to_ptr.vmem [resolvable:$true] %s151_s24 }
   0xd   : > { %s856_s21 = scalar_select %p695_p4, 1, 0 }
   0xe   : > { %s857_s22 = scalar_select %p699_p5, 1, 0 }
   0xf   : > { %p452_p6 = pneg %p699_p5  ;;  %s515_s29 = scalar_lea.hbm %s848_s1, 3072 }
  0x10   : > { %p516_p8 = scmp.ne.s32.totalorder %s848_s1, %s515_s29  ;;  %p522_p12 = scmp.lt.u32.totalorder %s515_s29, %s848_s1 }
  0x11   : > { %p707_p7 = pnand %p452_p6, %p687_p1 }
  0x13   : > { %p517_p9 = pneg %p707_p7 }
  0x15   : > { %p518_p10 = pnand %p517_p9, %p516_p8 }
  0x17   : > { %p519_p11 = pneg %p518_p10 }
  0x19   : > { %p524_p13 = pnand %p522_p12, %p519_p11 }
  0x1b   : > { %527 = shalt.err (!%p524_p13)
}
  0x1c   : > { %s528_s7 = scalar_lea.vmem %s152_s24, 3072  ;;  %p536_p6 = scmp.lt.s32.totalorder %s152_s24, %s152_s24 }
  0x1d   : > { %p529_p0 = scmp.ne.s32.totalorder %s152_s24, %s528_s7  ;;  %p537_p1 = scmp.lt.s32.totalorder %s528_s7, %s528_s7 }
  0x1f   : > { %p531_p2 = pnand %p529_p0, %p517_p9  ;;  %p538_p4 = por %p537_p1, %p536_p6 }
  0x21   : > { %p532_p3 = pneg %p531_p2 }
  0x23   : > { %p539_p5 = pnand %p538_p4, %p532_p3 }
  0x25   : > { %542 = shalt.err (!%p539_p5)
}
  0x26   : > { %s630_s8 = smov 128   ;;  %s631_s9 = smov 8  }
  0x27   : > { %455 = dma.hbm_to_vmem [thread:$0]  (!%p707_p7), %s848_s1, 3072, %s152_s24, [#allocation7], %s630_s8, %s630_s8, %s631_s9  }
  0x28   : > { %p32_p1 = scmp.ge.s32.totalorder %s30_s26, 2  ;;  %s39_s12 = sadd.s32 1, %s615_s16 }
  0x29   : > { %p46_p4 = scmp.ne.s32.totalorder %s615_s16, %s611_s15  ;;  %p47_p5 = scmp.eq.s32.totalorder %s627_s19, 0 }
  0x2a   : > { %s869_s26 = smov (%p32_p1, %s30_s26), 0  ;;  %p461_p9 = scmp.lt.s32.totalorder %s627_s19, 2 }
  0x2b   : > { %p48_p8 = por %p47_p5, %p46_p4  ;;  %s34_s13 = ssub.s32 %s623_s18, %s869_s26 }
  0x2c   : > { %s168_s14 = sand.u32 1, %s615_s16   ;;  %p37_p10 = scmp.eq.s32.totalorder %s34_s13, 0 }
  0x2d   : > { %s443_s2 = smul.u32 192, %s168_s14  ;;  %p741_p11 = pnand %p461_p9, %p48_p8 }
  0x2e   : > { %s746_s24 = scalar_select %p37_p10, %s615_s16, %s39_s12  }
  0x2f   : > { %s444_s25 = smul.u32 3072, %s623_s18  ;;  %s172_s27 = scalar_lea.vmem [#allocation4], %s443_s2 }
  0x30   : > { %s181_s28 = sshll.u32 %s172_s27, 4  ;;  %s756_s5 = scalar_lea.sflag [#allocation5], %s168_s14  ;;  %s754_s28 = int_to_ptr.vmem [resolvable:$true] %s181_s28 }
  0x31   : > { %s752_s4 = scalar_lea.hbm %s847_s0, %s444_s25  ;;  %p545_p12 = pneg %p741_p11 }
  0x32   : > { %s543_s6 = scalar_lea.hbm %s752_s4, 3072  ;;  %s548_s11 = scalar_lea.hbm %s847_s0, 6144 }
  0x33   : > { %p544_p7 = scmp.ne.s32.totalorder %s752_s4, %s543_s6  ;;  %p549_p2 = scmp.lt.u32.totalorder %s752_s4, %s847_s0 }
  0x34   : > { %p550_p3 = scmp.lt.u32.totalorder %s548_s11, %s543_s6  ;;  %p552_p1 = scmp.lt.u32.totalorder %s543_s6, %s752_s4 }
  0x35   : > { %p546_p13 = pnand %p545_p12, %p544_p7 }
  0x36   : > { %p551_p6 = por %p550_p3, %p549_p2 }
  0x37   : > { %p547_p0 = pneg %p546_p13 }
  0x38   : > { %p553_p4 = por %p552_p1, %p551_p6 }
  0x3a   : > { %p554_p5 = pnand %p553_p4, %p547_p0 }
  0x3c   : > { %557 = shalt.err (!%p554_p5)
}
  0x3d   : > { %s558_s14 = scalar_lea.vmem %s754_s28, 3072  ;;  %s632_s2 = smov [#allocation4]  }
  0x3e   : > { %p559_p8 = scmp.ne.s32.totalorder %s754_s28, %s558_s14  ;;  %s563_s25 = sshll.u32 %s632_s2, 4  ;;  %s564_s25 = int_to_ptr.vmem [resolvable:$false] %s563_s25 }
  0x3f   : > { %s565_s27 = scalar_lea.vmem %s564_s25, 6144  ;;  %p566_p7 = scmp.lt.s32.totalorder %s754_s28, %s564_s25 }
  0x40   : > { %p561_p9 = pnand %p559_p8, %p545_p12  ;;  %p567_p13 = scmp.lt.s32.totalorder %s565_s27, %s558_s14 }
  0x42   : > { %p562_p10 = pneg %p561_p9  ;;  %p568_p2 = por %p567_p13, %p566_p7 }
  0x44   : > { %p569_p3 = pnand %p568_p2, %p562_p10 }
  0x46   : > { %572 = shalt.err (!%p569_p3)
}
  0x47   : > { %459 = dma.hbm_to_vmem [thread:$0]  (!%p741_p11), %s752_s4, 3072, %s754_s28, %s756_s5, %s630_s8, %s630_s8, %s631_s9  }
  0x48   : > { %p860_p12 = scmp.ne.s32.totalorder %s857_s22, 0 }
  0x49   : > { %s195_s29 = sand.u32 (!%p860_p12), 1, %s611_s15   ;;  %p861_p0 = scmp.ne.s32.totalorder (!%p860_p12), %s856_s21, 0 }
  0x4a   : > { %193 = sbr.rel (%p860_p12) target bundleno = 304 (0x130), region = 32  ;;  %s196_s6 = scalar_lea.sflag (!%p860_p12), [#allocation5], %s195_s29 }
  0x4b   : > { %s445_s30 = smul.u32 (!%p860_p12), 192, %s195_s29 }
  0x4d   : > { %s790_s7 = scalar_lea.vmem (!%p860_p12), [#allocation4], %s445_s30 }
  0x51   : > { %598 = dma.done.wait (%p861_p0), %s196_s6, 3072  }
  0x52   : > { %600 = vsyncadd (%p861_p0), %s196_s6, 4294964224  ;;  %p862_p6 = scmp.ne.s32.totalorder %s855_s20, 0 }
  0x54   : > { %602 = dma.done.wait (%p862_p6), [#allocation7], 3072  }
  0x55   : > { %604 = vsyncadd (%p862_p6), [#allocation7], 4294964224  ;;  %v633_v0 = vmov 0.0   ;;  %v234_v1 = vld [vmem:[%s790_s7] sm:$0xff]  ;;  %v235_v2 = vld [vmem:[%s790_s7 + $0x8] sm:$0xff]  ;;  %vm342_vm0 = vcmask 1040384  }
  0x56   : > { %233 = vst [vmem:[#allocation2] sm:$0x1] %v633_v0  ;;  %v236_v3 = vld [vmem:[%s790_s7 + $0x10] sm:$0xff]  ;;  %v237_v4 = vld [vmem:[%s790_s7 + $0x18] sm:$0xff]  ;;  %v258_v5 = vld [vmem:[#allocation6] sm:$0xff]  ;;  %s346_s20 = sld [smem:[#allocation3]] }
  0x57   : > { %v259_v6 = vld [vmem:[#allocation6 + $0x8] sm:$0xff]  ;;  %v260_v7 = vld [vmem:[#allocation6 + $0x10] sm:$0xff]  ;;  %v261_v8 = vld [vmem:[#allocation6 + $0x18] sm:$0xff]  ;;  %v283_v9 = vmul.f32 %v258_v5, %v234_v1  ;;  %p226_p11 = scmp.lt.s32.totalorder %s619_s17, 1  ;;  %vm349_vm1 = vcmask 0  }
  0x58   : > { %v284_v10 = vmul.f32 %v259_v6, %v235_v2  ;;  %v285_v11 = vmul.f32 %v260_v7, %v236_v3  ;;  %v238_v12 = vld [vmem:[%s790_s7 + $0x20] sm:$0xff]  ;;  %v286_v14 = vmul.f32 %v261_v8, %v237_v4  ;;  %v239_v16 = vld [vmem:[%s790_s7 + $0x28] sm:$0xff]  ;;  %v240_v20 = vld [vmem:[%s790_s7 + $0x30] sm:$0xff] }
  0x59   : > { %v262_v13 = vld [vmem:[#allocation6 + $0x20] sm:$0xff]  ;;  %v263_v17 = vld [vmem:[#allocation6 + $0x28] sm:$0xff]  ;;  %v264_v21 = vld [vmem:[#allocation6 + $0x30] sm:$0xff]  ;;  %s871_s17 = smov (!%p226_p11, %s619_s17), 1 }
  0x5a   : > { %v307_v15 = vadd.f32 %v284_v10, %v283_v9  ;;  %v287_v18 = vmul.f32 %v262_v13, %v238_v12  ;;  %v288_v22 = vmul.f32 %v263_v17, %v239_v16  ;;  %v241_v24 = vld [vmem:[%s790_s7 + $0x38] sm:$0xff]  ;;  %v289_v26 = vmul.f32 %v264_v21, %v240_v20  ;;  %v242_v28 = vld [vmem:[%s790_s7 + $0x40] sm:$0xff]  ;;  %v243_v32 = vld [vmem:[%s790_s7 + $0x48] sm:$0xff]  ;;  %s228_s8 = scalar_lea.vmem %s850_s3, %s871_s17 }
  0x5b   : > { %v265_v25 = vld [vmem:[#allocation6 + $0x38] sm:$0xff]  ;;  %v266_v29 = vld [vmem:[#allocation6 + $0x40] sm:$0xff]  ;;  %v267_v33 = vld [vmem:[#allocation6 + $0x48] sm:$0xff] }
  0x5c   : > { %v308_v19 = vadd.f32 %v307_v15, %v285_v11  ;;  %v290_v30 = vmul.f32 %v265_v25, %v241_v24  ;;  %v291_v34 = vmul.f32 %v266_v29, %v242_v28  ;;  %v244_v36 = vld [vmem:[%s790_s7 + $0x50] sm:$0xff]  ;;  %v292_v38 = vmul.f32 %v267_v33, %v243_v32  ;;  %v245_v40 = vld [vmem:[%s790_s7 + $0x58] sm:$0xff]  ;;  %v246_v44 = vld [vmem:[%s790_s7 + $0x60] sm:$0xff] }
  0x5d   : > { %v268_v37 = vld [vmem:[#allocation6 + $0x50] sm:$0xff]  ;;  %v269_v41 = vld [vmem:[#allocation6 + $0x58] sm:$0xff]  ;;  %v270_v45 = vld [vmem:[#allocation6 + $0x60] sm:$0xff] }
  0x5e   : > { %v309_v23 = vadd.f32 %v308_v19, %v286_v14  ;;  %v293_v42 = vmul.f32 %v268_v37, %v244_v36  ;;  %v294_v46 = vmul.f32 %v269_v41, %v245_v40  ;;  %v247_v48 = vld [vmem:[%s790_s7 + $0x68] sm:$0xff]  ;;  %v295_v50 = vmul.f32 %v270_v45, %v246_v44  ;;  %v248_v52 = vld [vmem:[%s790_s7 + $0x70] sm:$0xff]  ;;  %v249_v56 = vld [vmem:[%s790_s7 + $0x78] sm:$0xff] }
  0x5f   : > { %v271_v49 = vld [vmem:[#allocation6 + $0x68] sm:$0xff]  ;;  %v272_v53 = vld [vmem:[#allocation6 + $0x70] sm:$0xff]  ;;  %v273_v57 = vld [vmem:[#allocation6 + $0x78] sm:$0xff] }
  0x60   : > { %v310_v27 = vadd.f32 %v309_v23, %v287_v18  ;;  %v296_v54 = vmul.f32 %v271_v49, %v247_v48  ;;  %v297_v58 = vmul.f32 %v272_v53, %v248_v52  ;;  %v250_v60 = vld [vmem:[%s790_s7 + $0x80] sm:$0xff]  ;;  %v298_v62 = vmul.f32 %v273_v57, %v249_v56  ;;  %v251_v0 = vld [vmem:[%s790_s7 + $0x88] sm:$0xff]  ;;  %v252_v4 = vld [vmem:[%s790_s7 + $0x90] sm:$0xff] }
  0x61   : > { %v274_v61 = vld [vmem:[#allocation6 + $0x80] sm:$0xff]  ;;  %v275_v1 = vld [vmem:[#allocation6 + $0x88] sm:$0xff]  ;;  %v276_v5 = vld [vmem:[#allocation6 + $0x90] sm:$0xff] }
  0x62   : > { %v311_v31 = vadd.f32 %v310_v27, %v288_v22  ;;  %v299_v2 = vmul.f32 %v274_v61, %v250_v60  ;;  %v300_v6 = vmul.f32 %v275_v1, %v251_v0  ;;  %v253_v8 = vld [vmem:[%s790_s7 + $0x98] sm:$0xff]  ;;  %v301_v10 = vmul.f32 %v276_v5, %v252_v4  ;;  %v254_v12 = vld [vmem:[%s790_s7 + $0xa0] sm:$0xff]  ;;  %v255_v16 = vld [vmem:[%s790_s7 + $0xa8] sm:$0xff] }
  0x63   : > { %v277_v9 = vld [vmem:[#allocation6 + $0x98] sm:$0xff]  ;;  %v278_v13 = vld [vmem:[#allocation6 + $0xa0] sm:$0xff]  ;;  %v279_v17 = vld [vmem:[#allocation6 + $0xa8] sm:$0xff] }
  0x64   : > { %v312_v35 = vadd.f32 %v311_v31, %v289_v26  ;;  %v302_v14 = vmul.f32 %v277_v9, %v253_v8  ;;  %v303_v18 = vmul.f32 %v278_v13, %v254_v12  ;;  %v256_v20 = vld [vmem:[%s790_s7 + $0xb0] sm:$0xff]  ;;  %v304_v22 = vmul.f32 %v279_v17, %v255_v16  ;;  %v257_v24 = vld [vmem:[%s790_s7 + $0xb8] sm:$0xff] }
  0x65   : > { %v280_v21 = vld [vmem:[#allocation6 + $0xb0] sm:$0xff]  ;;  %v281_v25 = vld [vmem:[#allocation6 + $0xb8] sm:$0xff] }
  0x66   : > { %v313_v39 = vadd.f32 %v312_v35, %v290_v30  ;;  %v305_v26 = vmul.f32 %v280_v21, %v256_v20  ;;  %v306_v28 = vmul.f32 %v281_v25, %v257_v24  ;;  %v282_v37 = vld [vmem:[#allocation2] sm:$0x1] }
  0x68   : > { %v314_v43 = vadd.f32 %v313_v39, %v291_v34 }
  0x6a   : > { %v315_v47 = vadd.f32 %v314_v43, %v292_v38 }
  0x6c   : > { %v316_v51 = vadd.f32 %v315_v47, %v293_v42  ;;  %v347_v42 = vstv %s346_s20 }
  0x6e   : > { %v317_v55 = vadd.f32 %v316_v51, %v294_v46 }
  0x70   : > { %v318_v59 = vadd.f32 %v317_v55, %v295_v50 }
  0x72   : > { %v319_v63 = vadd.f32 %v318_v59, %v296_v54 }
  0x74   : > { %v320_v3 = vadd.f32 %v319_v63, %v297_v58 }
  0x76   : > { %v321_v7 = vadd.f32 %v320_v3, %v298_v62 }
  0x78   : > { %v322_v11 = vadd.f32 %v321_v7, %v299_v2 }
  0x7a   : > { %v323_v15 = vadd.f32 %v322_v11, %v300_v6 }
  0x7c   : > { %v324_v19 = vadd.f32 %v323_v15, %v301_v10 }
  0x7e   : > { %v325_v23 = vadd.f32 %v324_v19, %v302_v14 }
  0x80   : > { %v326_v27 = vadd.f32 %v325_v23, %v303_v18 }
  0x82   : > { %v327_v29 = vadd.f32 %v326_v27, %v304_v22 }
  0x84   : > { %v328_v30 = vadd.f32 %v327_v29, %v305_v26 }
  0x86   : > { %v329_v31 = vadd.f32 %v328_v30, %v306_v28 }
  0x88   : > { %v330_v32 = vrot.slane %v329_v31, 4 }
  0x8a   : > { %v331_v33 = vadd.f32 %v330_v32, %v329_v31 }
  0x8c   : > { %v332_v34 = vrot.slane %v331_v33, 2 }
  0x8e   : > { %v333_v35 = vadd.f32 %v332_v34, %v331_v33 }
  0x90   : > { %v334_v36 = vrot.slane %v333_v35, 1 }
  0x92   : > { %v335_v38 = vadd.f32 %v334_v36, %v333_v35 }
  0x94   : > { %v336_v39 = vadd.f32 %v335_v38, %v282_v37 }
  0x96   : > { %337 = vst [vmem:[#allocation2] sm:$0x1] %v336_v39 }
  0x9d   : > { %v341_v40 = vld [vmem:[#allocation2] sm:$0x1] }
  0x9e   : > { %v343_v41 = vsel %vm342_vm0, %v341_v40, 0.0 }
  0x9f   : > { %344 = vadd.xlane.f32.xlu0 %v343_v41 }
 0x12c   : > { %v345_v43 = vpop.xlane.xlu0 %344 }
 0x12d   : > { %v348_v44 = vadd.f32 %v347_v42, %v345_v43 }
 0x12f   : > { %350 = vst.msk [vmem:[%s228_s8] sm:$0x1] %vm349_vm1, %v348_v44 }
 0x130 PF: > { %s18_s19 = sadd.s32 1, %s627_s19   ;;  %s863_s14 = smov %s611_s15 }
 0x131   : > { %p15_p1 = scmp.ge.s32.totalorder %s18_s19, 4   ;;  %s864_s15 = smov %s615_s16 }
 0x132   : > { %s865_s16 = smov %s746_s24  ;;  %s866_s17 = smov %s623_s18 }
 0x133   : > { %s867_s18 = smov %s869_s26  ;;  %17 = sbr.rel (!%p15_p1) target bundleno = 7 (0x7), region = 85 }
 0x13a   :  { %368 = vsyncpa [#allocation5], 1 }
 0x13b   :  { %370 = vsyncpa [#allocation5 + $0x1], 1 }
 0x13c   :  { %371 = vsyncpa [#allocation7], 1 }

</bundles_post_ra>
